<compile_context>
chip_gen: v7x
topology: tpu7x:2x2x1
jax: 0.10.0
libtpu: 0.0.40
codegen_flags: <defaults>
</compile_context>

<pallas_src>
import jax
import jax.numpy as jnp
from jax.experimental import pallas as pl
from jax.experimental.pallas import tpu as pltpu


def _lstm_seq_kernel(x_ref, h0_ref, c0_ref, w_ref, b_ref,
                     h_out_ref, c_out_ref, h_sc, c_sc):
    """Fused LSTM recurrence over grid=(T,).

    x_ref   : (1, B, Din)    input block for this time step
    h0_ref  : (1, B, H)      initial hidden state (read only at t == 0)
    c0_ref  : (1, B, H)      initial cell state   (read only at t == 0)
    w_ref   : (Din+H, 4H)    stacked [W_ih^T ; W_hh^T]  (VMEM-resident all steps)
    b_ref   : (1, 4H)        b_ih + b_hh
    h_out_ref, c_out_ref : (1, B, H) final states (written at t == T-1; aliased
                            onto h0/c0 so state updates in place in HBM)
    h_sc, c_sc : (B, H) f32 VMEM scratch carrying the recurrent state.
    Gate order [i, f, g, o] (PyTorch convention).
    """
    t = pl.program_id(0)
    n_t = pl.num_programs(0)
    H = h0_ref.shape[-1]

    @pl.when(t == 0)
    def _():
        h_sc[...] = h0_ref[0].astype(jnp.float32)
        c_sc[...] = c0_ref[0].astype(jnp.float32)

    x = x_ref[0].astype(jnp.float32)          # (B, Din)
    h_prev = h_sc[...]                         # (B, H), f32
    c_prev = c_sc[...]                         # (B, H), f32

    # Single fused MXU matmul: [x | h] @ [W_ih^T ; W_hh^T], f32 accumulation.
    xh = jnp.concatenate([x, h_prev], axis=-1)               # (B, Din + H)
    gates = jnp.dot(xh.astype(w_ref.dtype), w_ref[...],
                    preferred_element_type=jnp.float32)       # (B, 4H)
    gates = gates + b_ref[...].astype(jnp.float32)

    # Gate activations in f32 (EUP handles sigmoid/tanh).
    i_g = jax.nn.sigmoid(gates[:, 0 * H:1 * H])
    f_g = jax.nn.sigmoid(gates[:, 1 * H:2 * H])
    g_g = jnp.tanh(gates[:, 2 * H:3 * H])
    o_g = jax.nn.sigmoid(gates[:, 3 * H:4 * H])

    c_new = f_g * c_prev + i_g * g_g
    h_new = o_g * jnp.tanh(c_new)

    h_sc[...] = h_new
    c_sc[...] = c_new

    @pl.when(t == n_t - 1)
    def _():
        h_out_ref[0] = h_new.astype(h_out_ref.dtype)
        c_out_ref[0] = c_new.astype(c_out_ref.dtype)


def lstm_seq_pallas(x_seq, h, c, w_stacked, bias):
    """Run T fused LSTM steps in one pallas_call.

    x_seq     : (T, B, Din)
    h, c      : (1, B, H)  initial states
    w_stacked : (Din+H, 4H)  = [W_ih^T ; W_hh^T]
    bias      : (1, 4H)      = b_ih + b_hh
    returns (h_T, c_T), each (1, B, H) with h.dtype / c.dtype.
    """
    T, B, Din = x_seq.shape
    H = h.shape[-1]
    K = Din + H

    h_new, c_new = pl.pallas_call(
        _lstm_seq_kernel,
        out_shape=(
            jax.ShapeDtypeStruct((1, B, H), h.dtype),
            jax.ShapeDtypeStruct((1, B, H), c.dtype),
        ),
        grid=(T,),
        in_specs=[
            pl.BlockSpec((1, B, Din), lambda t: (t, 0, 0)),   # x_t streamed over T
            pl.BlockSpec((1, B, H), lambda t: (0, 0, 0)),     # h0 (fetched once)
            pl.BlockSpec((1, B, H), lambda t: (0, 0, 0)),     # c0 (fetched once)
            pl.BlockSpec((K, 4 * H), lambda t: (0, 0)),       # weights, VMEM-resident
            pl.BlockSpec((1, 4 * H), lambda t: (0, 0)),       # bias, VMEM-resident
        ],
        out_specs=(
            pl.BlockSpec((1, B, H), lambda t: (0, 0, 0)),     # written back once
            pl.BlockSpec((1, B, H), lambda t: (0, 0, 0)),
        ),
        scratch_shapes=[
            pltpu.VMEM((B, H), jnp.float32),                  # h carry
            pltpu.VMEM((B, H), jnp.float32),                  # c carry
        ],
        # h -> h_out, c -> c_out: update state in place, no fresh HBM alloc per call.
        input_output_aliases={1: 0, 2: 1},
        compiler_params=pltpu.CompilerParams(
            dimension_semantics=("arbitrary",)),              # recurrence over T
    )(x_seq, h, c, w_stacked, bias)
    return h_new, c_new


def dsa_encoder_lstm_forward(x, h, c, params):
    """Mirror of Dsa_EncoderLSTM.forward (one LSTM step).

    x : (batch, 1, latent_dim)   h, c : (1, batch, hidden_dim)
    returns (h, c), each (1, batch, hidden_dim)
    """
    # x.permute(1, 0, 2) with seq_len == 1 -> (1, batch, latent_dim) == (T=1, B, Din).
    x_seq = jnp.transpose(x, (1, 0, 2))
    return lstm_seq_pallas(x_seq, h, c, params["w_stacked"], params["bias"])


def dsa_encoder_lstm_run_sequence(x_seq, h, c, params):
    """Fused multi-step driver: applies forward() T times in ONE kernel launch.

    x_seq : (T, batch, latent_dim) -- equivalent to calling forward() per step.
    """
    return lstm_seq_pallas(x_seq, h, c, params["w_stacked"], params["bias"])


def init_params(key, latent_dim, hidden_dim, weight_dtype=jnp.float32):
    """nn.LSTM-shaped parameters with the weight pre-stacked as [W_ih^T ; W_hh^T].

    weight_dtype=jnp.bfloat16 is recommended on v6e/v7x (bf16-native MXU, half
    the weight DMA); keep f32 here to match the f32 reference numerics exactly.
    """
    k = 1.0 / jnp.sqrt(hidden_dim)
    k1, k2, k3, k4 = jax.random.split(key, 4)
    w_ih = jax.random.uniform(k1, (4 * hidden_dim, latent_dim), jnp.float32, -k, k)
    w_hh = jax.random.uniform(k2, (4 * hidden_dim, hidden_dim), jnp.float32, -k, k)
    b_ih = jax.random.uniform(k3, (4 * hidden_dim,), jnp.float32, -k, k)
    b_hh = jax.random.uniform(k4, (4 * hidden_dim,), jnp.float32, -k, k)
    w_stacked = jnp.concatenate([w_ih.T, w_hh.T], axis=0)     # (Din + H, 4H)
    return {
        "w_stacked": w_stacked.astype(weight_dtype),
        "bias": (b_ih + b_hh)[None, :],                        # (1, 4H)
    }


def _reference_step(xt, h0, c0, params):
    """Pure-JAX single LSTM step (same math as torch.nn.LSTM)."""
    H = h0.shape[-1]
    xh = jnp.concatenate([xt, h0], axis=-1)
    gates = xh @ params["w_stacked"].astype(jnp.float32) + params["bias"]
    i_g = jax.nn.sigmoid(gates[:, 0 * H:1 * H])
    f_g = jax.nn.sigmoid(gates[:, 1 * H:2 * H])
    g_g = jnp.tanh(gates[:, 2 * H:3 * H])
    o_g = jax.nn.sigmoid(gates[:, 3 * H:4 * H])
    c_new = f_g * c0 + i_g * g_g
    h_new = o_g * jnp.tanh(c_new)
    return h_new, c_new


if __name__ == "__main__":
    batch = 8
    latent_dim = 4
    hidden_dim = 32
    T = 6

    key = jax.random.PRNGKey(0)
    kp, kx, kh, kc, ks = jax.random.split(key, 5)

    params = init_params(kp, latent_dim, hidden_dim)
    x_in = jax.random.normal(kx, (batch, 1, latent_dim), jnp.float32)
    h_in = jax.random.normal(kh, (1, batch, hidden_dim), jnp.float32)
    c_in = jax.random.normal(kc, (1, batch, hidden_dim), jnp.float32)

    # --- module forward: single LSTM step -------------------------------------
    fwd = jax.jit(dsa_encoder_lstm_forward)
    h_out, c_out = fwd(x_in, h_in, c_in, params)
    jax.block_until_ready((h_out, c_out))

    h_ref, c_ref = _reference_step(x_in[:, 0, :], h_in[0], c_in[0], params)
    assert h_out.shape == (1, batch, hidden_dim)
    assert c_out.shape == (1, batch, hidden_dim)
    assert jnp.allclose(h_out[0], h_ref, atol=1e-5), "h mismatch vs reference (step)"
    assert jnp.allclose(c_out[0], c_ref, atol=1e-5), "c mismatch vs reference (step)"

    # --- fused T-step driver: one pallas_call for the whole recurrence --------
    x_seq = jax.random.normal(ks, (T, batch, latent_dim), jnp.float32)
    seq_fwd = jax.jit(dsa_encoder_lstm_run_sequence)
    h_T, c_T = seq_fwd(x_seq, h_in, c_in, params)
    jax.block_until_ready((h_T, c_T))

    h_r, c_r = h_in[0], c_in[0]
    for t in range(T):
        h_r, c_r = _reference_step(x_seq[t], h_r, c_r, params)
    assert jnp.allclose(h_T[0], h_r, atol=1e-4), "h mismatch vs reference (sequence)"
    assert jnp.allclose(c_T[0], c_r, atol=1e-4), "c mismatch vs reference (sequence)"

    print("KERNEL_OK")
</pallas_src>

<mosaic_0001>
module attributes {stable_mosaic.version = 11 : i64} {
  func.func @_lstm_seq_kernel(%arg0: i32, %arg1: memref<1x8x4xf32, #tpu.memory_space<vmem>>, %arg2: memref<1x8x32xf32, #tpu.memory_space<vmem>>, %arg3: memref<1x8x32xf32, #tpu.memory_space<vmem>>, %arg4: memref<36x128xf32, #tpu.memory_space<vmem>>, %arg5: memref<1x128xf32, #tpu.memory_space<vmem>>, %arg6: memref<1x8x32xf32, #tpu.memory_space<vmem>>, %arg7: memref<1x8x32xf32, #tpu.memory_space<vmem>>, %arg8: memref<8x32xf32, #tpu.memory_space<vmem>>, %arg9: memref<8x32xf32, #tpu.memory_space<vmem>>) attributes {dimension_semantics = [#tpu.dimension_semantics<arbitrary>], iteration_bounds = array<i64: 1>, scalar_prefetch = 0 : i64, scratch_operands = 2 : i64, tpu.core_type = #tpu.core_type<tc>, window_params = [{transform_indices = @transform_0, window_bounds = array<i64: 1, 8, 4>}, {pipeline_mode = #tpu.pipeline_mode<synchronous>, transform_indices = @transform_1, window_bounds = array<i64: 1, 8, 32>}, {pipeline_mode = #tpu.pipeline_mode<synchronous>, transform_indices = @transform_2, window_bounds = array<i64: 1, 8, 32>}, {pipeline_mode = #tpu.pipeline_mode<synchronous>, transform_indices = @transform_3, window_bounds = array<i64: 36, 128>}, {pipeline_mode = #tpu.pipeline_mode<synchronous>, transform_indices = @transform_4, window_bounds = array<i64: 1, 128>}, {pipeline_mode = #tpu.pipeline_mode<synchronous>, transform_indices = @transform_5, window_bounds = array<i64: 1, 8, 32>}, {pipeline_mode = #tpu.pipeline_mode<synchronous>, transform_indices = @transform_6, window_bounds = array<i64: 1, 8, 32>}]} {
    %c0_i32 = arith.constant 0 : i32
    %0 = arith.cmpi eq, %arg0, %c0_i32 : i32
    %1 = arith.extui %0 : i1 to i32
    %c0_i32_0 = arith.constant 0 : i32
    %2 = arith.cmpi ne, %1, %c0_i32_0 : i32
    scf.if %2 {
      %c0_20 = arith.constant 0 : index
      %c0_21 = arith.constant 0 : index
      %c0_22 = arith.constant 0 : index
      %43 = vector.load %arg2[%c0_20, %c0_21, %c0_22] : memref<1x8x32xf32, #tpu.memory_space<vmem>>, vector<1x8x32xf32>
      %44 = vector.shape_cast %43 : vector<1x8x32xf32> to vector<8x32xf32>
      %c0_23 = arith.constant 0 : index
      %c0_24 = arith.constant 0 : index
      %45 = vector.load %arg8[%c0_23, %c0_24] : memref<8x32xf32, #tpu.memory_space<vmem>>, vector<8x32xf32>
      tpu.vector_store %arg8[%c0_23, %c0_24], %44 {strides = array<i32>} : memref<8x32xf32, #tpu.memory_space<vmem>>, vector<8x32xf32>,
      %c0_25 = arith.constant 0 : index
      %c0_26 = arith.constant 0 : index
      %c0_27 = arith.constant 0 : index
      %46 = vector.load %arg3[%c0_25, %c0_26, %c0_27] : memref<1x8x32xf32, #tpu.memory_space<vmem>>, vector<1x8x32xf32>
      %47 = vector.shape_cast %46 : vector<1x8x32xf32> to vector<8x32xf32>
      %c0_28 = arith.constant 0 : index
      %c0_29 = arith.constant 0 : index
      %48 = vector.load %arg9[%c0_28, %c0_29] : memref<8x32xf32, #tpu.memory_space<vmem>>, vector<8x32xf32>
      tpu.vector_store %arg9[%c0_28, %c0_29], %47 {strides = array<i32>} : memref<8x32xf32, #tpu.memory_space<vmem>>, vector<8x32xf32>,
    } else {
    }
    %c0 = arith.constant 0 : index
    %c0_1 = arith.constant 0 : index
    %c0_2 = arith.constant 0 : index
    %3 = vector.load %arg1[%c0, %c0_1, %c0_2] : memref<1x8x4xf32, #tpu.memory_space<vmem>>, vector<1x8x4xf32>
    %4 = vector.shape_cast %3 : vector<1x8x4xf32> to vector<8x4xf32>
    %c0_3 = arith.constant 0 : index
    %c0_4 = arith.constant 0 : index
    %5 = vector.load %arg8[%c0_3, %c0_4] : memref<8x32xf32, #tpu.memory_space<vmem>>, vector<8x32xf32>
    %c0_5 = arith.constant 0 : index
    %c0_6 = arith.constant 0 : index
    %6 = vector.load %arg9[%c0_5, %c0_6] : memref<8x32xf32, #tpu.memory_space<vmem>>, vector<8x32xf32>
    %7 = tpu.concatenate %4, %5 in 1 : vector<8x4xf32>, vector<8x32xf32> -> vector<8x36xf32>
    %c0_7 = arith.constant 0 : index
    %c0_8 = arith.constant 0 : index
    %8 = vector.load %arg4[%c0_7, %c0_8] : memref<36x128xf32, #tpu.memory_space<vmem>>, vector<36x128xf32>
    %cst = arith.constant dense<0.000000e+00> : vector<8x128xf32>
    %9 = tpu.matmul %7, %8, %cst {dimension_numbers = #tpu.dot_dimension_numbers<[1], [0], [0], [1], [0, 0, 1, 1], [], []>} : vector<8x36xf32>, vector<36x128xf32>, vector<8x128xf32> -> vector<8x128xf32>
    %c0_9 = arith.constant 0 : index
    %c0_10 = arith.constant 0 : index
    %10 = vector.load %arg5[%c0_9, %c0_10] : memref<1x128xf32, #tpu.memory_space<vmem>>, vector<1x128xf32>
    %11 = vector.broadcast %10 : vector<1x128xf32> to vector<8x128xf32>
    %12 = arith.addf %9, %11 : vector<8x128xf32>
    %13 = vector.extract_strided_slice %12 {offsets = [0, 0], sizes = [8, 32], strides = [1, 1]} : vector<8x128xf32> to vector<8x32xf32>
    %14 = arith.negf %13 : vector<8x32xf32>
    %15 = math.exp %14 : vector<8x32xf32>
    %cst_11 = arith.constant 1.000000e+00 : f32
    %16 = vector.broadcast %cst_11 : f32 to vector<8x32xf32>
    %17 = arith.addf %16, %15 : vector<8x32xf32>
    %18 = arith.divf %16, %17 : vector<8x32xf32>
    %19 = vector.extract_strided_slice %12 {offsets = [0, 32], sizes = [8, 32], strides = [1, 1]} : vector<8x128xf32> to vector<8x32xf32>
    %20 = arith.negf %19 : vector<8x32xf32>
    %21 = math.exp %20 : vector<8x32xf32>
    %cst_12 = arith.constant 1.000000e+00 : f32
    %22 = vector.broadcast %cst_12 : f32 to vector<8x32xf32>
    %23 = arith.addf %22, %21 : vector<8x32xf32>
    %24 = arith.divf %22, %23 : vector<8x32xf32>
    %25 = vector.extract_strided_slice %12 {offsets = [0, 64], sizes = [8, 32], strides = [1, 1]} : vector<8x128xf32> to vector<8x32xf32>
    %26 = math.tanh %25 : vector<8x32xf32>
    %27 = vector.extract_strided_slice %12 {offsets = [0, 96], sizes = [8, 32], strides = [1, 1]} : vector<8x128xf32> to vector<8x32xf32>
    %28 = arith.negf %27 : vector<8x32xf32>
    %29 = math.exp %28 : vector<8x32xf32>
    %cst_13 = arith.constant 1.000000e+00 : f32
    %30 = vector.broadcast %cst_13 : f32 to vector<8x32xf32>
    %31 = arith.addf %30, %29 : vector<8x32xf32>
    %32 = arith.divf %30, %31 : vector<8x32xf32>
    %33 = arith.mulf %24, %6 : vector<8x32xf32>
    %34 = arith.mulf %18, %26 : vector<8x32xf32>
    %35 = arith.addf %33, %34 : vector<8x32xf32>
    %36 = math.tanh %35 : vector<8x32xf32>
    %37 = arith.mulf %32, %36 : vector<8x32xf32>
    %c0_14 = arith.constant 0 : index
    %c0_15 = arith.constant 0 : index
    %38 = vector.load %arg8[%c0_14, %c0_15] : memref<8x32xf32, #tpu.memory_space<vmem>>, vector<8x32xf32>
    tpu.vector_store %arg8[%c0_14, %c0_15], %37 {strides = array<i32>} : memref<8x32xf32, #tpu.memory_space<vmem>>, vector<8x32xf32>,
    %c0_16 = arith.constant 0 : index
    %c0_17 = arith.constant 0 : index
    %39 = vector.load %arg9[%c0_16, %c0_17] : memref<8x32xf32, #tpu.memory_space<vmem>>, vector<8x32xf32>
    tpu.vector_store %arg9[%c0_16, %c0_17], %35 {strides = array<i32>} : memref<8x32xf32, #tpu.memory_space<vmem>>, vector<8x32xf32>,
    %c0_i32_18 = arith.constant 0 : i32
    %40 = arith.cmpi eq, %arg0, %c0_i32_18 : i32
    %41 = arith.extui %40 : i1 to i32
    %c0_i32_19 = arith.constant 0 : i32
    %42 = arith.cmpi ne, %41, %c0_i32_19 : i32
    scf.if %42 {
      %c0_20 = arith.constant 0 : index
      %c0_21 = arith.constant 0 : index
      %c0_22 = arith.constant 0 : index
      %43 = vector.load %arg6[%c0_20, %c0_21, %c0_22] : memref<1x8x32xf32, #tpu.memory_space<vmem>>, vector<1x8x32xf32>
      %44 = vector.shape_cast %43 : vector<1x8x32xf32> to vector<8x32xf32>
      %45 = vector.shape_cast %37 : vector<8x32xf32> to vector<1x8x32xf32>
      tpu.vector_store %arg6[%c0_20, %c0_21, %c0_22], %45 {strides = array<i32>} : memref<1x8x32xf32, #tpu.memory_space<vmem>>, vector<1x8x32xf32>,
      %c0_23 = arith.constant 0 : index
      %c0_24 = arith.constant 0 : index
      %c0_25 = arith.constant 0 : index
      %46 = vector.load %arg7[%c0_23, %c0_24, %c0_25] : memref<1x8x32xf32, #tpu.memory_space<vmem>>, vector<1x8x32xf32>
      %47 = vector.shape_cast %46 : vector<1x8x32xf32> to vector<8x32xf32>
      %48 = vector.shape_cast %35 : vector<8x32xf32> to vector<1x8x32xf32>
      tpu.vector_store %arg7[%c0_23, %c0_24, %c0_25], %48 {strides = array<i32>} : memref<1x8x32xf32, #tpu.memory_space<vmem>>, vector<1x8x32xf32>,
    } else {
    }
    return
  }
  func.func @transform_0(%arg0: i32) -> (i32, i32, i32) {
    %c0_i32 = arith.constant 0 : i32
    %c0_i32_0 = arith.constant 0 : i32
    %c0_i32_1 = arith.constant 0 : i32
    return %arg0, %c0_i32, %c0_i32_0 : i32, i32, i32
  }
  func.func @transform_1(%arg0: i32) -> (i32, i32, i32) {
    %c0_i32 = arith.constant 0 : i32
    %c0_i32_0 = arith.constant 0 : i32
    %c0_i32_1 = arith.constant 0 : i32
    %c0_i32_2 = arith.constant 0 : i32
    return %c0_i32, %c0_i32_0, %c0_i32_1 : i32, i32, i32
  }
  func.func @transform_2(%arg0: i32) -> (i32, i32, i32) {
    %c0_i32 = arith.constant 0 : i32
    %c0_i32_0 = arith.constant 0 : i32
    %c0_i32_1 = arith.constant 0 : i32
    %c0_i32_2 = arith.constant 0 : i32
    return %c0_i32, %c0_i32_0, %c0_i32_1 : i32, i32, i32
  }
  func.func @transform_3(%arg0: i32) -> (i32, i32) {
    %c0_i32 = arith.constant 0 : i32
    %c0_i32_0 = arith.constant 0 : i32
    %c0_i32_1 = arith.constant 0 : i32
    return %c0_i32, %c0_i32_0 : i32, i32
  }
  func.func @transform_4(%arg0: i32) -> (i32, i32) {
    %c0_i32 = arith.constant 0 : i32
    %c0_i32_0 = arith.constant 0 : i32
    %c0_i32_1 = arith.constant 0 : i32
    return %c0_i32, %c0_i32_0 : i32, i32
  }
  func.func @transform_5(%arg0: i32) -> (i32, i32, i32) {
    %c0_i32 = arith.constant 0 : i32
    %c0_i32_0 = arith.constant 0 : i32
    %c0_i32_1 = arith.constant 0 : i32
    %c0_i32_2 = arith.constant 0 : i32
    return %c0_i32, %c0_i32_0, %c0_i32_1 : i32, i32, i32
  }
  func.func @transform_6(%arg0: i32) -> (i32, i32, i32) {
    %c0_i32 = arith.constant 0 : i32
    %c0_i32_0 = arith.constant 0 : i32
    %c0_i32_1 = arith.constant 0 : i32
    %c0_i32_2 = arith.constant 0 : i32
    return %c0_i32, %c0_i32_0, %c0_i32_1 : i32, i32, i32
  }
}

</mosaic_0001>

<bundles_post_ra>
// kernel: dsa_encoder_lstm_forward.1
= control target key start
LH: loop header
LB: loop body
LE: loop exit
PB: predicated region body
PF: predicated region fallthrough
CT: control target
= control target key end

     0   :  { %12 = vsyncpa [#allocation5], 0  ;;  %s498_s0 = inlined_call_operand.vmem [shape: f32[1,8,4], index: 0, kind: input, shape index: {}]   ;;  %s499_s1 = inlined_call_operand.hbm [shape: f32[1,8,32], index: 1, kind: input, shape index: {}, may-alias: {1,5}]   ;;  %s500_s2 = inlined_call_operand.hbm [shape: f32[1,8,32], index: 2, kind: input, shape index: {}, may-alias: {2,6}]   ;;  %s501_s3 = inlined_call_operand.vmem [shape: f32[36,128], index: 3, kind: input, shape index: {}]   ;;  %s502_s4 = inlined_call_operand.vmem [shape: f32[1,128], index: 4, kind: input, shape index: {}]   ;;  %s503_s5 = inlined_call_operand.hbm [shape: f32[1,8,32], index: 5, kind: output, shape index: {0}, may-alias: {1,5}]   ;;  %s504_s6 = inlined_call_operand.hbm [shape: f32[1,8,32], index: 6, kind: output, shape index: {1}, may-alias: {2,6}]  }
   0x1   :  { %13 = vsyncpa [#allocation8], 0 }
   0x2   :  { %14 = vsyncpa [#allocation6], 0 }
   0x3   :  { %15 = vsyncpa [#allocation11], 0  ;;  %s374_s21 = smov [#allocation4]   ;;  %s375_s23 = smov [#allocation7]  }
   0x4   :  { %s24_s22 = sshll.u32 %s374_s21, 4  ;;  %s34_s24 = sshll.u32 %s375_s23, 4  ;;  %s25_s22 = int_to_ptr.vmem [resolvable:$true] %s24_s22  ;;  %s35_s24 = int_to_ptr.vmem [resolvable:$true] %s34_s24 }
   0x5   :  { %s278_s27 = scalar_lea.hbm %s499_s1, 128 }
   0x6   :  { %p279_p0 = scmp.ne.s32.totalorder %s499_s1, %s278_s27  ;;  %p282_p1 = scmp.lt.u32.totalorder %s278_s27, %s499_s1 }
   0x8   :  { %p284_p2 = pnand %p282_p1, %p279_p0 }
   0xa   :  { %287 = shalt.err (!%p284_p2)
}
   0xb   :  { %s288_s8 = scalar_lea.vmem %s25_s22, 128  ;;  %p293_p4 = scmp.lt.s32.totalorder %s25_s22, %s25_s22 }
   0xc   :  { %p289_p3 = scmp.ne.s32.totalorder %s25_s22, %s288_s8  ;;  %p294_p5 = scmp.lt.s32.totalorder %s288_s8, %s288_s8 }
   0xe   :  { %p295_p6 = por %p294_p5, %p293_p4 }
  0x10   :  { %p296_p7 = pnand %p295_p6, %p289_p3 }
  0x12   :  { %299 = shalt.err (!%p296_p7)
}
  0x13   :  { %27 = dma.hbm_to_vmem [thread:$0]  %s499_s1, 128, %s25_s22, [#allocation5]  }
  0x14   :  { %s300_s13 = scalar_lea.hbm %s500_s2, 128 }
  0x15   :  { %p301_p8 = scmp.ne.s32.totalorder %s500_s2, %s300_s13  ;;  %p304_p9 = scmp.lt.u32.totalorder %s300_s13, %s500_s2 }
  0x17   :  { %p306_p10 = pnand %p304_p9, %p301_p8 }
  0x19   :  { %309 = shalt.err (!%p306_p10)
}
  0x1a   :  { %s310_s18 = scalar_lea.vmem %s35_s24, 128  ;;  %p315_p12 = scmp.lt.s32.totalorder %s35_s24, %s35_s24 }
  0x1b   :  { %p311_p11 = scmp.ne.s32.totalorder %s35_s24, %s310_s18  ;;  %p316_p13 = scmp.lt.s32.totalorder %s310_s18, %s310_s18 }
  0x1d   :  { %p317_p0 = por %p316_p13, %p315_p12 }
  0x1f   :  { %p318_p1 = pnand %p317_p0, %p311_p11 }
  0x21   :  { %321 = shalt.err (!%p318_p1)
}
  0x22   :  { %37 = dma.hbm_to_vmem [thread:$0]  %s500_s2, 128, %s35_s24, [#allocation8]  }
  0x23   :  { %366 = dma.done.wait [#allocation5], 128  }
  0x24   :  { %367 = vsyncadd [#allocation5], 4294967168 }
  0x25   :  { %368 = dma.done.wait [#allocation8], 128  }
  0x26   :  { %369 = vsyncadd [#allocation8], 4294967168  ;;  %v376_v0 = vmov 0.0|0.0   ;;  %vm377_vm0 = vmmov 0   ;;  %v378_v1 = vmov 0.0   ;;  %vm53_vm1 = vcmask 261120  }
  0x27   :  { %253 = vmatprep.subr.bf16.mxu0 %v376_v0  ;;  %250 = vmatprep.mubr.msk.f32.mxu0 %vm377_vm0, %v378_v1  ;;  %v52_v2 = vld [vmem:[#allocation4] sm:$0xff]  ;;  %v66_v3 = vld [vmem:[%s501_s3] sm:$0xff]  ;;  %v67_v4 = vld [vmem:[%s501_s3 + $0x8] sm:$0xff]  ;;  %vm82_vm2 = vcmask 1043456   ;;  %s379_s29 = smov 4   ;;  %s380_s30 = smov 32  }
  0x28   :  { %54 = vst.msk [vmem:[#allocation2] sm:$0xff] %vm53_vm1, %v52_v2  ;;  %v254_v5 = vpack.c.bf16 %v67_v4, %v66_v3  ;;  %v68_v6 = vld [vmem:[%s501_s3 + $0x10] sm:$0xff]  ;;  %v69_v7 = vld [vmem:[%s501_s3 + $0x18] sm:$0xff]  ;;  %v70_v11 = vld [vmem:[%s501_s3 + $0x20] sm:$0xf]  ;;  %vm64_vm3 = vcmask 31744  }
  0x29   :  { %v55_v8 = vld [vmem:[#allocation7] sm:$0xff]  ;;  %v257_v9 = vpack.c.bf16 %v69_v7, %v68_v6  ;;  %v57_v13 = vld [vmem:[%s498_s0] sm:$0xff]  ;;  %vm78_vm4 = vcmask 293888   ;;  %s381_s3 = smov 64   ;;  %s382_s0 = smov 96  }
  0x2a   :  { %255 = vmatpush3.bf16.msra.mxu0 %v254_v5  ;;  %56 = vst.msk [vmem:[#allocation3] sm:$0xff] %vm53_vm1, %v55_v8  ;;  %v230_v16 = vld [vmem:[%s502_s4] ss:$0 sm:$0xff]  ;;  %s383_s4 = smov [#allocation10]  }
  0x2b   :  { %256 = vmatprep.subr.bf16.mxu0 %v376_v0  ;;  %s216_s11 = sshll.u32 %s383_s4, 4  ;;  %s217_s11 = int_to_ptr.vmem [resolvable:$true] %s216_s11 }
  0x2c   :  { %s322_s12 = scalar_lea.vmem %s217_s11, 128  ;;  %p327_p3 = scmp.lt.s32.totalorder %s217_s11, %s217_s11 }
  0x2d   :  { %p323_p2 = scmp.ne.s32.totalorder %s217_s11, %s322_s12  ;;  %p328_p4 = scmp.lt.s32.totalorder %s322_s12, %s322_s12 }
  0x2e   :  { %258 = vmatpush3.bf16.msra.mxu0 %v257_v9 }
  0x2f   :  { %v58_v10 = vld [vmem:[#allocation2] sm:$0xff]  ;;  %248 = vmatprep.subr.mxu0 %v378_v1  ;;  %p329_p5 = por %p328_p4, %p327_p3 }
  0x30   :  { %61 = vrot.lane.b32.xlu0 %v58_v10, %s379_s29 }
  0x31   :  { %v59_v12 = vld [vmem:[#allocation3] sm:$0xff]  ;;  %p330_p6 = pnand %p329_p5, %p323_p2 }
  0x32   :  { %249 = vmatpush3.msk.msra.mxu0 %vm82_vm2, %v70_v11  ;;  %164 = vrot.lane.b32.xlu1 %v59_v12, %s380_s30 }
  0xa2   :  { %v62_v14 = vpop.permute.xlu0 %61 }
  0xa3   :  { %v65_v15 = vsel %vm64_vm3, %v57_v13, %v62_v14 }
  0xa4   :  { %251 = vmatmul.mubr.msk.f32.vlgmr.msra.gmra.mrb[0].mxu0 %vm78_vm4, %v65_v15  ;;  %v165_v27 = vpop.permute.xlu1 %164 }
 0x177   :  { %v152_v17 = vpop.f32.mrb[0].mxu0 }
 0x178   :  { %v153_v18 = vadd.f32 %v230_v16, %v152_v17  ;;  %v252_v19 = vpop.f32.mrb[1].mxu0 }
 0x17a   :  { %270 = vtanh.f32 %v153_v18  ;;  %v233_v21 = vmul.f32 -1.442695, %v153_v18 }
 0x17c   :  { %272 = vpow2.f32 %v233_v21 }
 0x184   :  { %v271_v20 = vpop.eup %270 }
 0x185   :  { %169 = vrot.lane.b32.xlu0 %v271_v20, %s381_s3 }
 0x186   :  { %v273_v22 = vpop.eup %272 }
 0x187   :  { %v159_v23 = vadd.f32 1.0, %v273_v22 }
 0x189   :  { %274 = vrcp.f32 %v159_v23 }
 0x193   :  { %v275_v24 = vpop.eup %274 }
 0x194   :  { %v167_v28 = vmul.f32 %v275_v24, %v165_v27 }
 0x1f7   :  { %v170_v25 = vpop.permute.xlu0 %169 }
 0x1f8   :  { %v172_v26 = vmul.f32 %v275_v24, %v170_v25 }
 0x1fa   :  { %174 = vrot.lane.b32.xlu1 %v172_v26, %s380_s30 }
 0x26c   :  { %v175_v29 = vpop.permute.xlu1 %174 }
 0x26d   :  { %v177_v30 = vadd.f32 %v175_v29, %v167_v28 }
 0x26f   :  { %276 = vtanh.f32 %v177_v30 }
 0x279   :  { %v277_v31 = vpop.eup %276 }
 0x27a   :  { %180 = vrot.lane.b32.xlu0 %v277_v31, %s381_s3 }
 0x27e   :  { %191 = vrot.lane.b32.xlu0 %v177_v30, %s382_s0 }
 0x2ec   :  { %v181_v32 = vpop.permute.xlu0 %180 }
 0x2ed   :  { %v183_v33 = vmul.f32 %v275_v24, %v181_v32 }
 0x2ef   :  { %185 = vrot.lane.b32.xlu1 %v183_v33, %s380_s30 }
 0x2f0   :  { %v192_v34 = vpop.permute.xlu0 %191 }
 0x2f1   :  { %194 = vst.msk [vmem:[#allocation3] sm:$0xff] %vm53_vm1, %v192_v34  ;;  %199 = vst.msk [vmem:[#allocation10] sm:$0xff] %vm53_vm1, %v192_v34 }
 0x2f2   :  { %333 = shalt.err (!%p330_p6)
}
 0x2f3   :  { %s334_s15 = scalar_lea.hbm %s504_s6, 128 }
 0x2f4   :  { %p335_p7 = scmp.ne.s32.totalorder %s504_s6, %s334_s15  ;;  %p338_p8 = scmp.lt.u32.totalorder %s334_s15, %s504_s6 }
 0x2f6   :  { %p340_p9 = pnand %p338_p8, %p335_p7 }
 0x2f8   :  { %343 = shalt.err (!%p340_p9)
}
 0x2f9   :  { %219 = dma.vmem_to_hbm [thread:$0]  %s217_s11, 128, %s504_s6, [#allocation11]  }
 0x2fa   :  { %s384_s21 = smov [#allocation9]  }
 0x2fb   :  { %s206_s22 = sshll.u32 %s384_s21, 4  ;;  %s207_s22 = int_to_ptr.vmem [resolvable:$true] %s206_s22 }
 0x2fc   :  { %s344_s23 = scalar_lea.vmem %s207_s22, 128  ;;  %p349_p11 = scmp.lt.s32.totalorder %s207_s22, %s207_s22 }
 0x2fd   :  { %p345_p10 = scmp.ne.s32.totalorder %s207_s22, %s344_s23  ;;  %p350_p12 = scmp.lt.s32.totalorder %s344_s23, %s344_s23 }
 0x2ff   :  { %p351_p13 = por %p350_p12, %p349_p11 }
 0x301   :  { %p352_p0 = pnand %p351_p13, %p345_p10 }
 0x361   :  { %v186_v35 = vpop.permute.xlu1 %185 }
 0x362   :  { %189 = vst.msk [vmem:[#allocation2] sm:$0xff] %vm53_vm1, %v186_v35  ;;  %198 = vst.msk [vmem:[#allocation9] sm:$0xff] %vm53_vm1, %v186_v35 }
 0x363   :  { %355 = shalt.err (!%p352_p0)
}
 0x364   :  { %s356_s25 = scalar_lea.hbm %s503_s5, 128 }
 0x365   :  { %p357_p1 = scmp.ne.s32.totalorder %s503_s5, %s356_s25  ;;  %p360_p2 = scmp.lt.u32.totalorder %s356_s25, %s503_s5 }
 0x367   :  { %p362_p3 = pnand %p360_p2, %p357_p1 }
 0x369   :  { %365 = shalt.err (!%p362_p3)
}
 0x36a   :  { %209 = dma.vmem_to_hbm [thread:$0]  %s207_s22, 128, %s503_s5, [#allocation6]  }
 0x36b   :  { %370 = dma.done.wait [#allocation6], 128  }
 0x36c   :  { %371 = vsyncadd [#allocation6], 4294967168 }
 0x36d   :  { %372 = dma.done.wait [#allocation11], 128  }
 0x36e   :  { %373 = vsyncadd [#allocation11], 4294967168 }
 0x36f   :  { %226 = vsyncpa [#allocation5], 1 }
 0x370   :  { %227 = vsyncpa [#allocation8], 1 }
 0x371   :  { %228 = vsyncpa [#allocation6], 1 }
 0x372   :  { %229 = vsyncpa [#allocation11], 1 }

</bundles_post_ra>
